<compile_context>
chip_gen: v7x
topology: tpu7x:2x2x1
jax: 0.10.0
libtpu: 0.0.40
codegen_flags: <defaults>
</compile_context>

<pallas_src>
import functools

import jax
import jax.numpy as jnp
from jax.experimental import pallas as pl
from jax.experimental.pallas import tpu as pltpu


# ---------------------------------------------------------------------------
# Kernel
# ---------------------------------------------------------------------------
def vae_kernel(x_ref, eps_ref,
               w1_ref, b1_ref, w23_ref, b23_ref,
               w4_ref, b4_ref, w5_ref, b5_ref,
               xrec_ref, mulv_ref):
    wdt = w1_ref.dtype            # MXU operand dtype (f32 or bf16)
    zp = eps_ref.shape[-1]        # padded latent dim (multiple of 128)

    # encode: h = relu(fc1(x))   (x cast to MXU dtype in-kernel, f32 accumulation)
    x = x_ref[...].astype(wdt)
    h = jnp.dot(x, w1_ref[...], preferred_element_type=jnp.float32) + b1_ref[...]
    h = jnp.maximum(h, 0.0)

    # fused fc2/fc3: one matmul -> [mu || log_var], each half 128-lane aligned
    mulv = jnp.dot(h.astype(wdt), w23_ref[...],
                   preferred_element_type=jnp.float32) + b23_ref[...]
    mu = mulv[:, :zp]
    log_var = mulv[:, zp:]

    # reparameterize: z = mu + eps * exp(log_var / 2)
    # (padded columns: mu = log_var = eps = 0  ->  z = 0 exactly)
    z = mu + eps_ref[...] * jnp.exp(log_var * 0.5)

    # decode: h2 = relu(fc4(z)); x_reconst = sigmoid(fc5(h2))
    h2 = jnp.dot(z.astype(wdt), w4_ref[...],
                 preferred_element_type=jnp.float32) + b4_ref[...]
    h2 = jnp.maximum(h2, 0.0)
    logits = jnp.dot(h2.astype(wdt), w5_ref[...],
                     preferred_element_type=jnp.float32) + b5_ref[...]

    # sigmoid via tanh: one EUP op on the widest tensor (instead of exp + recip)
    xrec_ref[...] = (0.5 * jnp.tanh(0.5 * logits) + 0.5).astype(xrec_ref.dtype)
    mulv_ref[...] = mulv.astype(mulv_ref.dtype)


# ---------------------------------------------------------------------------
# Wrapper helpers
# ---------------------------------------------------------------------------
def _round_up(x, m):
    return (x + m - 1) // m * m


def _pad_axis(a, axis, new_size):
    pad = new_size - a.shape[axis]
    if pad <= 0:
        return a
    widths = [(0, 0)] * a.ndim
    widths[axis] = (0, pad)
    return jnp.pad(a, widths)


def _num_tensorcores():
    """TensorCores per device: 2 on dual-TC / megacore chips (v7x, v4), else 1."""
    try:
        kind = jax.devices()[0].device_kind.lower()
    except Exception:
        return 1
    if "v7" in kind or "7x" in kind or "v4" in kind:
        return 2
    return 1


def _vmem_capacity_bytes():
    try:
        return int(pltpu.get_tpu_info().vmem_capacity_bytes)
    except Exception:
        return 64 << 20        # conservative: v7x per-TensorCore VMEM


def _vmem_estimate(tile_b, ip, hp, zp, wbytes):
    """Conservative VMEM budget: weights counted double-buffered, f32 I/O tiles."""
    weights = (ip * hp + hp * 2 * zp + zp * hp + hp * ip) * wbytes
    biases = (hp + 2 * zp + hp + ip) * 4
    io_tiles = 2 * tile_b * (ip + zp + ip + 2 * zp) * 4    # 2x-buffered in/out tiles
    interm = tile_b * (2 * hp + 3 * zp + ip) * 4           # h, mulv, z, h2, logits
    return 2 * (weights + biases) + io_tiles + interm + (4 << 20)


def _choose_tile_b(B, compute_dtype, tile_b, budget, ip, hp, zp, wbytes):
    # bf16 packs 2 rows/sublane -> (16, 128) min tile; f32 -> (8, 128).
    min_sub = 16 if jnp.dtype(compute_dtype) == jnp.dtype(jnp.bfloat16) else 8
    if tile_b is None:
        # One grid step on single-TC chips; two steps on dual-TC chips so the
        # "parallel" batch axis shards across both TensorCores.
        tile_b = pl.cdiv(B, _num_tensorcores())
    tile_b = max(min_sub, _round_up(min(tile_b, B), min_sub))
    # Shrink only if the conservative VMEM estimate would not fit.
    while tile_b > min_sub and _vmem_estimate(tile_b, ip, hp, zp, wbytes) > budget:
        tile_b = max(min_sub, _round_up(tile_b // 2, min_sub))
    return tile_b


# ---------------------------------------------------------------------------
# Fused forward
# ---------------------------------------------------------------------------
@functools.partial(jax.jit, static_argnames=("tile_b", "compute_dtype"))
def vae_forward(x, eps, params, *, tile_b=None, compute_dtype=jnp.float32):
    """params: dict with w1..w5 as (in, out) and b1..b5 as (1, out), all float32.

    compute_dtype selects the MXU operand dtype (jnp.float32 or jnp.bfloat16);
    accumulation, elementwise math and all outputs are always f32.
    Returns (x_reconst, mu, log_var).
    """
    B, image_size = x.shape
    h_dim = params["w1"].shape[1]
    z_dim = params["w2"].shape[1]

    LANE = 128
    ip = _round_up(image_size, LANE)   # padded image_size
    hp = _round_up(h_dim, LANE)        # padded h_dim
    zp = _round_up(z_dim, LANE)        # padded z_dim (per half of mu||log_var)

    wbytes = jnp.dtype(compute_dtype).itemsize
    vmem_cap = _vmem_capacity_bytes()
    cap_hi = min(100 << 20, vmem_cap - (16 << 20))   # 48 MiB on v7x, 100 MiB on v5e/v6e

    tb = _choose_tile_b(B, compute_dtype, tile_b, cap_hi, ip, hp, zp, wbytes)
    B_pad = _round_up(B, tb)
    grid = (B_pad // tb,)

    # --- weight prep: pre-transposed (in, out), zero-padded to 128-lane multiples ---
    def pad_w(w, rin, cout):
        return _pad_axis(_pad_axis(w, 0, rin), 1, cout).astype(compute_dtype)

    def pad_b(b, cout):
        return _pad_axis(b, 1, cout).astype(jnp.float32)

    w1 = pad_w(params["w1"], ip, hp)
    b1 = pad_b(params["b1"], hp)
    # fused fc2/fc3: each half padded to zp lanes -> [mu(zp) || log_var(zp)]
    w23 = jnp.concatenate([pad_w(params["w2"], hp, zp),
                           pad_w(params["w3"], hp, zp)], axis=1)
    b23 = jnp.concatenate([pad_b(params["b2"], zp),
                           pad_b(params["b3"], zp)], axis=1)
    w4 = pad_w(params["w4"], zp, hp)
    b4 = pad_b(params["b4"], hp)
    w5 = pad_w(params["w5"], hp, ip)
    b5 = pad_b(params["b5"], ip)

    # x / eps stay f32: the kernel casts to the MXU dtype on the VPU.
    # Pads are no-ops whenever the sizes are already aligned (demo: x untouched).
    x_in = _pad_axis(_pad_axis(x, 1, ip), 0, B_pad)
    eps_in = _pad_axis(_pad_axis(eps.astype(jnp.float32), 1, zp), 0, B_pad)

    def batched(feat):
        return pl.BlockSpec((tb, feat), lambda i: (i, 0))

    def resident(shape):
        # Constant index_map: the pipeline copies this block exactly once, so it
        # stays VMEM-resident across batch tiles.  (Single-buffering it via
        # pipeline_mode=pl.Buffered(1) would halve its allocation; instead the
        # VMEM estimate above budgets it 2x, which keeps the limit safe on v7x.)
        return pl.BlockSpec(shape, lambda i: (0, 0))

    vmem_limit = int(min(max(_vmem_estimate(tb, ip, hp, zp, wbytes), 32 << 20), cap_hi))

    xrec_p, mulv_p = pl.pallas_call(
        vae_kernel,
        grid=grid,
        out_shape=(
            jax.ShapeDtypeStruct((B_pad, ip), jnp.float32),        # x_reconst (padded)
            jax.ShapeDtypeStruct((B_pad, 2 * zp), jnp.float32),    # [mu || log_var] (padded)
        ),
        in_specs=[
            batched(ip),                   # x
            batched(zp),                   # eps
            resident((ip, hp)),            # w1
            resident((1, hp)),             # b1
            resident((hp, 2 * zp)),        # w23 (fused fc2/fc3)
            resident((1, 2 * zp)),         # b23
            resident((zp, hp)),            # w4
            resident((1, hp)),             # b4
            resident((hp, ip)),            # w5
            resident((1, ip)),             # b5
        ],
        out_specs=(
            batched(ip),                   # x_reconst
            batched(2 * zp),               # [mu || log_var]
        ),
        compiler_params=pltpu.CompilerParams(
            dimension_semantics=("parallel",),
            vmem_limit_bytes=vmem_limit,
        ),
    )(x_in, eps_in, w1, b1, w23, b23, w4, b4, w5, b5)

    x_reconst = xrec_p[:B, :image_size]
    mu = mulv_p[:B, :z_dim]
    log_var = mulv_p[:B, zp:zp + z_dim]
    return x_reconst, mu, log_var


# ---------------------------------------------------------------------------
# Parameter init + pure-JAX reference
# ---------------------------------------------------------------------------
def init_linear(key, in_features, out_features):
    """Mimics torch.nn.Linear default init U[-1/sqrt(in), 1/sqrt(in)].
    Weight returned already transposed to (in, out); bias as (1, out)."""
    kw, kb = jax.random.split(key)
    bound = 1.0 / jnp.sqrt(jnp.float32(in_features))
    w = jax.random.uniform(kw, (in_features, out_features), jnp.float32, -bound, bound)
    b = jax.random.uniform(kb, (1, out_features), jnp.float32, -bound, bound)
    return w, b


def make_params(key, image_size, h_dim, z_dim):
    keys = jax.random.split(key, 5)
    p = {}
    p["w1"], p["b1"] = init_linear(keys[0], image_size, h_dim)  # fc1
    p["w2"], p["b2"] = init_linear(keys[1], h_dim, z_dim)       # fc2
    p["w3"], p["b3"] = init_linear(keys[2], h_dim, z_dim)       # fc3
    p["w4"], p["b4"] = init_linear(keys[3], z_dim, h_dim)       # fc4
    p["w5"], p["b5"] = init_linear(keys[4], h_dim, image_size)  # fc5
    return p


def vae_forward_ref(x, eps, p):
    """Pure-JAX reference matching the PyTorch module semantics."""
    h = jnp.maximum(x @ p["w1"] + p["b1"], 0.0)
    mu = h @ p["w2"] + p["b2"]
    log_var = h @ p["w3"] + p["b3"]
    z = mu + eps * jnp.exp(log_var / 2.0)
    h2 = jnp.maximum(z @ p["w4"] + p["b4"], 0.0)
    x_reconst = jax.nn.sigmoid(h2 @ p["w5"] + p["b5"])
    return x_reconst, mu, log_var


# ---------------------------------------------------------------------------
# Demo / correctness check
# ---------------------------------------------------------------------------
if __name__ == "__main__":
    # Small shapes consistent with the module (flat features through Linear stack).
    # h_dim / z_dim deliberately un-aligned to exercise the 128-lane padding path.
    B, IMAGE_SIZE, H_DIM, Z_DIM = 128, 128, 64, 32

    key = jax.random.PRNGKey(0)
    k_x, k_eps, k_params = jax.random.split(key, 3)

    x = jax.random.uniform(k_x, (B, IMAGE_SIZE), jnp.float32)   # "image" input
    eps = jax.random.normal(k_eps, (B, Z_DIM), jnp.float32)     # reparameterization noise
    params = make_params(k_params, IMAGE_SIZE, H_DIM, Z_DIM)

    xr_ref, mu_ref, lv_ref = vae_forward_ref(x, eps, params)

    # --- f32 path, default tiling (1 grid step on v5e/v6e, 2 shards on v7x) ---
    x_reconst, mu, log_var = vae_forward(x, eps, params, compute_dtype=jnp.float32)
    jax.block_until_ready((x_reconst, mu, log_var))
    assert x_reconst.shape == (B, IMAGE_SIZE) and mu.shape == (B, Z_DIM)
    assert jnp.allclose(x_reconst, xr_ref, atol=1e-5, rtol=1e-5)
    assert jnp.allclose(mu, mu_ref, atol=1e-5, rtol=1e-5)
    assert jnp.allclose(log_var, lv_ref, atol=1e-5, rtol=1e-5)

    # --- f32 path with an explicit small tile (exercises the multi-step pipeline) ---
    xr_t, mu_t, lv_t = vae_forward(x, eps, params, tile_b=32, compute_dtype=jnp.float32)
    jax.block_until_ready((xr_t, mu_t, lv_t))
    assert jnp.allclose(xr_t, xr_ref, atol=1e-5, rtol=1e-5)
    assert jnp.allclose(mu_t, mu_ref, atol=1e-5, rtol=1e-5)
    assert jnp.allclose(lv_t, lv_ref, atol=1e-5, rtol=1e-5)

    # --- bf16 MXU-operand path (v6e / v7x fast path), loose tolerance ---
    xr_bf, mu_bf, lv_bf = vae_forward(x, eps, params, compute_dtype=jnp.bfloat16)
    jax.block_until_ready((xr_bf, mu_bf, lv_bf))
    assert jnp.allclose(xr_bf, xr_ref, atol=5e-2, rtol=5e-2)
    assert jnp.allclose(mu_bf, mu_ref, atol=5e-2, rtol=5e-2)
    assert jnp.allclose(lv_bf, lv_ref, atol=5e-2, rtol=5e-2)

    print("KERNEL_OK")
</pallas_src>

<mosaic_0001>
module attributes {stable_mosaic.version = 11 : i64} {
  func.func @vae_kernel(%arg0: i32, %arg1: memref<128x128xf32, #tpu.memory_space<vmem>>, %arg2: memref<128x128xf32, #tpu.memory_space<vmem>>, %arg3: memref<128x128xf32, #tpu.memory_space<vmem>>, %arg4: memref<1x128xf32, #tpu.memory_space<vmem>>, %arg5: memref<128x256xf32, #tpu.memory_space<vmem>>, %arg6: memref<1x256xf32, #tpu.memory_space<vmem>>, %arg7: memref<128x128xf32, #tpu.memory_space<vmem>>, %arg8: memref<1x128xf32, #tpu.memory_space<vmem>>, %arg9: memref<128x128xf32, #tpu.memory_space<vmem>>, %arg10: memref<1x128xf32, #tpu.memory_space<vmem>>, %arg11: memref<128x128xf32, #tpu.memory_space<vmem>>, %arg12: memref<128x256xf32, #tpu.memory_space<vmem>>) attributes {dimension_semantics = [#tpu.dimension_semantics<parallel>], iteration_bounds = array<i64: 1>, scalar_prefetch = 0 : i64, scratch_operands = 0 : i64, tpu.core_type = #tpu.core_type<tc>, window_params = [{transform_indices = @transform_0, window_bounds = array<i64: 128, 128>}, {transform_indices = @transform_1, window_bounds = array<i64: 128, 128>}, {pipeline_mode = #tpu.pipeline_mode<synchronous>, transform_indices = @transform_2, window_bounds = array<i64: 128, 128>}, {pipeline_mode = #tpu.pipeline_mode<synchronous>, transform_indices = @transform_3, window_bounds = array<i64: 1, 128>}, {pipeline_mode = #tpu.pipeline_mode<synchronous>, transform_indices = @transform_4, window_bounds = array<i64: 128, 256>}, {pipeline_mode = #tpu.pipeline_mode<synchronous>, transform_indices = @transform_5, window_bounds = array<i64: 1, 256>}, {pipeline_mode = #tpu.pipeline_mode<synchronous>, transform_indices = @transform_6, window_bounds = array<i64: 128, 128>}, {pipeline_mode = #tpu.pipeline_mode<synchronous>, transform_indices = @transform_7, window_bounds = array<i64: 1, 128>}, {pipeline_mode = #tpu.pipeline_mode<synchronous>, transform_indices = @transform_8, window_bounds = array<i64: 128, 128>}, {pipeline_mode = #tpu.pipeline_mode<synchronous>, transform_indices = @transform_9, window_bounds = array<i64: 1, 128>}, {transform_indices = @transform_10, window_bounds = array<i64: 128, 128>}, {transform_indices = @transform_11, window_bounds = array<i64: 128, 256>}]} {
    %c0 = arith.constant 0 : index
    %c0_0 = arith.constant 0 : index
    %0 = vector.load %arg1[%c0, %c0_0] : memref<128x128xf32, #tpu.memory_space<vmem>>, vector<128x128xf32>
    %c0_1 = arith.constant 0 : index
    %c0_2 = arith.constant 0 : index
    %1 = vector.load %arg3[%c0_1, %c0_2] : memref<128x128xf32, #tpu.memory_space<vmem>>, vector<128x128xf32>
    %cst = arith.constant dense<0.000000e+00> : vector<128x128xf32>
    %2 = tpu.matmul %0, %1, %cst {dimension_numbers = #tpu.dot_dimension_numbers<[1], [0], [0], [1], [0, 0, 1, 1], [], []>} : vector<128x128xf32>, vector<128x128xf32>, vector<128x128xf32> -> vector<128x128xf32>
    %c0_3 = arith.constant 0 : index
    %c0_4 = arith.constant 0 : index
    %3 = vector.load %arg4[%c0_3, %c0_4] : memref<1x128xf32, #tpu.memory_space<vmem>>, vector<1x128xf32>
    %4 = vector.broadcast %3 : vector<1x128xf32> to vector<128x128xf32>
    %5 = arith.addf %2, %4 : vector<128x128xf32>
    %cst_5 = arith.constant 0.000000e+00 : f32
    %6 = vector.broadcast %cst_5 : f32 to vector<128x128xf32>
    %7 = arith.maximumf %5, %6 : vector<128x128xf32>
    %c0_6 = arith.constant 0 : index
    %c0_7 = arith.constant 0 : index
    %8 = vector.load %arg5[%c0_6, %c0_7] : memref<128x256xf32, #tpu.memory_space<vmem>>, vector<128x256xf32>
    %cst_8 = arith.constant dense<0.000000e+00> : vector<128x256xf32>
    %9 = tpu.matmul %7, %8, %cst_8 {dimension_numbers = #tpu.dot_dimension_numbers<[1], [0], [0], [1], [0, 0, 1, 1], [], []>} : vector<128x128xf32>, vector<128x256xf32>, vector<128x256xf32> -> vector<128x256xf32>
    %c0_9 = arith.constant 0 : index
    %c0_10 = arith.constant 0 : index
    %10 = vector.load %arg6[%c0_9, %c0_10] : memref<1x256xf32, #tpu.memory_space<vmem>>, vector<1x256xf32>
    %11 = vector.broadcast %10 : vector<1x256xf32> to vector<128x256xf32>
    %12 = arith.addf %9, %11 : vector<128x256xf32>
    %13 = vector.extract_strided_slice %12 {offsets = [0, 0], sizes = [128, 128], strides = [1, 1]} : vector<128x256xf32> to vector<128x128xf32>
    %14 = vector.extract_strided_slice %12 {offsets = [0, 128], sizes = [128, 128], strides = [1, 1]} : vector<128x256xf32> to vector<128x128xf32>
    %c0_11 = arith.constant 0 : index
    %c0_12 = arith.constant 0 : index
    %15 = vector.load %arg2[%c0_11, %c0_12] : memref<128x128xf32, #tpu.memory_space<vmem>>, vector<128x128xf32>
    %cst_13 = arith.constant 5.000000e-01 : f32
    %16 = vector.broadcast %cst_13 : f32 to vector<128x128xf32>
    %17 = arith.mulf %14, %16 : vector<128x128xf32>
    %18 = math.exp %17 : vector<128x128xf32>
    %19 = arith.mulf %15, %18 : vector<128x128xf32>
    %20 = arith.addf %13, %19 : vector<128x128xf32>
    %c0_14 = arith.constant 0 : index
    %c0_15 = arith.constant 0 : index
    %21 = vector.load %arg7[%c0_14, %c0_15] : memref<128x128xf32, #tpu.memory_space<vmem>>, vector<128x128xf32>
    %cst_16 = arith.constant dense<0.000000e+00> : vector<128x128xf32>
    %22 = tpu.matmul %20, %21, %cst_16 {dimension_numbers = #tpu.dot_dimension_numbers<[1], [0], [0], [1], [0, 0, 1, 1], [], []>} : vector<128x128xf32>, vector<128x128xf32>, vector<128x128xf32> -> vector<128x128xf32>
    %c0_17 = arith.constant 0 : index
    %c0_18 = arith.constant 0 : index
    %23 = vector.load %arg8[%c0_17, %c0_18] : memref<1x128xf32, #tpu.memory_space<vmem>>, vector<1x128xf32>
    %24 = vector.broadcast %23 : vector<1x128xf32> to vector<128x128xf32>
    %25 = arith.addf %22, %24 : vector<128x128xf32>
    %cst_19 = arith.constant 0.000000e+00 : f32
    %26 = vector.broadcast %cst_19 : f32 to vector<128x128xf32>
    %27 = arith.maximumf %25, %26 : vector<128x128xf32>
    %c0_20 = arith.constant 0 : index
    %c0_21 = arith.constant 0 : index
    %28 = vector.load %arg9[%c0_20, %c0_21] : memref<128x128xf32, #tpu.memory_space<vmem>>, vector<128x128xf32>
    %cst_22 = arith.constant dense<0.000000e+00> : vector<128x128xf32>
    %29 = tpu.matmul %27, %28, %cst_22 {dimension_numbers = #tpu.dot_dimension_numbers<[1], [0], [0], [1], [0, 0, 1, 1], [], []>} : vector<128x128xf32>, vector<128x128xf32>, vector<128x128xf32> -> vector<128x128xf32>
    %c0_23 = arith.constant 0 : index
    %c0_24 = arith.constant 0 : index
    %30 = vector.load %arg10[%c0_23, %c0_24] : memref<1x128xf32, #tpu.memory_space<vmem>>, vector<1x128xf32>
    %31 = vector.broadcast %30 : vector<1x128xf32> to vector<128x128xf32>
    %32 = arith.addf %29, %31 : vector<128x128xf32>
    %cst_25 = arith.constant 5.000000e-01 : f32
    %33 = vector.broadcast %cst_25 : f32 to vector<128x128xf32>
    %34 = arith.mulf %33, %32 : vector<128x128xf32>
    %35 = math.tanh %34 : vector<128x128xf32>
    %cst_26 = arith.constant 5.000000e-01 : f32
    %36 = vector.broadcast %cst_26 : f32 to vector<128x128xf32>
    %37 = arith.mulf %36, %35 : vector<128x128xf32>
    %cst_27 = arith.constant 5.000000e-01 : f32
    %38 = vector.broadcast %cst_27 : f32 to vector<128x128xf32>
    %39 = arith.addf %37, %38 : vector<128x128xf32>
    %c0_28 = arith.constant 0 : index
    %c0_29 = arith.constant 0 : index
    %40 = vector.load %arg11[%c0_28, %c0_29] : memref<128x128xf32, #tpu.memory_space<vmem>>, vector<128x128xf32>
    tpu.vector_store %arg11[%c0_28, %c0_29], %39 {strides = array<i32>} : memref<128x128xf32, #tpu.memory_space<vmem>>, vector<128x128xf32>,
    %c0_30 = arith.constant 0 : index
    %c0_31 = arith.constant 0 : index
    %41 = vector.load %arg12[%c0_30, %c0_31] : memref<128x256xf32, #tpu.memory_space<vmem>>, vector<128x256xf32>
    tpu.vector_store %arg12[%c0_30, %c0_31], %12 {strides = array<i32>} : memref<128x256xf32, #tpu.memory_space<vmem>>, vector<128x256xf32>,
    return
  }
  func.func @transform_0(%arg0: i32) -> (i32, i32) {
    %c0_i32 = arith.constant 0 : i32
    %c0_i32_0 = arith.constant 0 : i32
    return %arg0, %c0_i32 : i32, i32
  }
  func.func @transform_1(%arg0: i32) -> (i32, i32) {
    %c0_i32 = arith.constant 0 : i32
    %c0_i32_0 = arith.constant 0 : i32
    return %arg0, %c0_i32 : i32, i32
  }
  func.func @transform_2(%arg0: i32) -> (i32, i32) {
    %c0_i32 = arith.constant 0 : i32
    %c0_i32_0 = arith.constant 0 : i32
    %c0_i32_1 = arith.constant 0 : i32
    return %c0_i32, %c0_i32_0 : i32, i32
  }
  func.func @transform_3(%arg0: i32) -> (i32, i32) {
    %c0_i32 = arith.constant 0 : i32
    %c0_i32_0 = arith.constant 0 : i32
    %c0_i32_1 = arith.constant 0 : i32
    return %c0_i32, %c0_i32_0 : i32, i32
  }
  func.func @transform_4(%arg0: i32) -> (i32, i32) {
    %c0_i32 = arith.constant 0 : i32
    %c0_i32_0 = arith.constant 0 : i32
    %c0_i32_1 = arith.constant 0 : i32
    return %c0_i32, %c0_i32_0 : i32, i32
  }
  func.func @transform_5(%arg0: i32) -> (i32, i32) {
    %c0_i32 = arith.constant 0 : i32
    %c0_i32_0 = arith.constant 0 : i32
    %c0_i32_1 = arith.constant 0 : i32
    return %c0_i32, %c0_i32_0 : i32, i32
  }
  func.func @transform_6(%arg0: i32) -> (i32, i32) {
    %c0_i32 = arith.constant 0 : i32
    %c0_i32_0 = arith.constant 0 : i32
    %c0_i32_1 = arith.constant 0 : i32
    return %c0_i32, %c0_i32_0 : i32, i32
  }
  func.func @transform_7(%arg0: i32) -> (i32, i32) {
    %c0_i32 = arith.constant 0 : i32
    %c0_i32_0 = arith.constant 0 : i32
    %c0_i32_1 = arith.constant 0 : i32
    return %c0_i32, %c0_i32_0 : i32, i32
  }
  func.func @transform_8(%arg0: i32) -> (i32, i32) {
    %c0_i32 = arith.constant 0 : i32
    %c0_i32_0 = arith.constant 0 : i32
    %c0_i32_1 = arith.constant 0 : i32
    return %c0_i32, %c0_i32_0 : i32, i32
  }
  func.func @transform_9(%arg0: i32) -> (i32, i32) {
    %c0_i32 = arith.constant 0 : i32
    %c0_i32_0 = arith.constant 0 : i32
    %c0_i32_1 = arith.constant 0 : i32
    return %c0_i32, %c0_i32_0 : i32, i32
  }
  func.func @transform_10(%arg0: i32) -> (i32, i32) {
    %c0_i32 = arith.constant 0 : i32
    %c0_i32_0 = arith.constant 0 : i32
    return %arg0, %c0_i32 : i32, i32
  }
  func.func @transform_11(%arg0: i32) -> (i32, i32) {
    %c0_i32 = arith.constant 0 : i32
    %c0_i32_0 = arith.constant 0 : i32
    return %arg0, %c0_i32 : i32, i32
  }
}

</mosaic_0001>

<bundles_post_ra>
// kernel: vae_forward.1
= control target key start
LH: loop header
LB: loop body
LE: loop exit
PB: predicated region body
PF: predicated region fallthrough
CT: control target
= control target key end

     0   :  { %s2216_s0 = inlined_call_operand.vmem [shape: f32[128,128], index: 0, kind: input, shape index: {}]   ;;  %s2217_s1 = inlined_call_operand.vmem [shape: f32[128,128], index: 1, kind: input, shape index: {}]   ;;  %s2218_s2 = inlined_call_operand.vmem [shape: f32[128,128], index: 2, kind: input, shape index: {}]   ;;  %s2219_s3 = inlined_call_operand.vmem [shape: f32[1,128], index: 3, kind: input, shape index: {}]   ;;  %s2220_s4 = inlined_call_operand.vmem [shape: f32[128,256], index: 4, kind: input, shape index: {}]   ;;  %s2221_s5 = inlined_call_operand.vmem [shape: f32[1,256], index: 5, kind: input, shape index: {}]   ;;  %s2222_s6 = inlined_call_operand.vmem [shape: f32[128,128], index: 6, kind: input, shape index: {}]   ;;  %s2223_s7 = inlined_call_operand.vmem [shape: f32[1,128], index: 7, kind: input, shape index: {}]   ;;  %s2224_s8 = inlined_call_operand.vmem [shape: f32[128,128], index: 8, kind: input, shape index: {}]   ;;  %s2225_s9 = inlined_call_operand.vmem [shape: f32[1,128], index: 9, kind: input, shape index: {}]   ;;  %s2226_s10 = inlined_call_operand.hbm [shape: f32[128,128], index: 10, kind: output, shape index: {0}]   ;;  %s2227_s11 = inlined_call_operand.vmem [shape: f32[128,256], index: 11, kind: output, shape index: {1}]  }
   0x1   :  { %v54_v0 = vld [vmem:[%s2218_s2] sm:$0xff]  ;;  %v55_v1 = vld [vmem:[%s2218_s2 + $0x8] sm:$0xff]  ;;  %v56_v2 = vld [vmem:[%s2218_s2 + $0x10] sm:$0xff] }
   0x2   :  { %v1290_v3 = vpack.c.bf16 %v55_v1, %v54_v0  ;;  %v57_v4 = vld [vmem:[%s2218_s2 + $0x18] sm:$0xff]  ;;  %v58_v6 = vld [vmem:[%s2218_s2 + $0x20] sm:$0xff]  ;;  %v59_v7 = vld [vmem:[%s2218_s2 + $0x28] sm:$0xff] }
   0x3   :  { %v1294_v5 = vpack.c.bf16 %v57_v4, %v56_v2  ;;  %v1298_v8 = vpack.c.bf16 %v59_v7, %v58_v6  ;;  %v38_v9 = vld [vmem:[%s2216_s0] sm:$0xff]  ;;  %v60_v10 = vld [vmem:[%s2218_s2 + $0x30] sm:$0xff]  ;;  %v61_v11 = vld [vmem:[%s2218_s2 + $0x38] sm:$0xff] }
   0x4   :  { %1291 = vmatprep.subr.bf16.mxu0 %v1290_v3  ;;  %1154 = vmatprep.mubr.f32.mxu0 %v38_v9  ;;  %v1302_v12 = vpack.c.bf16 %v61_v11, %v60_v10  ;;  %v62_v13 = vld [vmem:[%s2218_s2 + $0x40] sm:$0xff]  ;;  %v63_v14 = vld [vmem:[%s2218_s2 + $0x48] sm:$0xff]  ;;  %v241_v16 = vld [vmem:[%s2220_s4 + $0x18] sm:$0xff] }
   0x5   :  { %1293 = vmatpush3.bf16.msra.mxu0 %v1290_v3  ;;  %v239_v15 = vld [vmem:[%s2220_s4 + $0x8] sm:$0xff]  ;;  %v238_v17 = vld [vmem:[%s2220_s4] sm:$0xff]  ;;  %v240_v18 = vld [vmem:[%s2220_s4 + $0x10] sm:$0xff]  ;;  %v1306_v24 = vpack.c.bf16 %v63_v14, %v62_v13 }
   0x6   :  { %1295 = vmatprep.subr.bf16.mxu0 %v1294_v5  ;;  %v1322_v19 = vpack.c.bf16 %v241_v16, %v239_v15  ;;  %v1324_v20 = vpack.c.bf16 %v240_v18, %v238_v17  ;;  %v243_v21 = vld [vmem:[%s2220_s4 + $0x28] sm:$0xff]  ;;  %v245_v22 = vld [vmem:[%s2220_s4 + $0x38] sm:$0xff]  ;;  %v242_v23 = vld [vmem:[%s2220_s4 + $0x20] sm:$0xff] }
   0x7   :  { %v1326_v25 = vpack.c.bf16 %v245_v22, %v243_v21  ;;  %v244_v26 = vld [vmem:[%s2220_s4 + $0x30] sm:$0xff]  ;;  %v247_v27 = vld [vmem:[%s2220_s4 + $0x48] sm:$0xff]  ;;  %v249_v28 = vld [vmem:[%s2220_s4 + $0x58] sm:$0xff] }
   0x8   :  { %v64_v29 = vld [vmem:[%s2218_s2 + $0x50] sm:$0xff]  ;;  %v65_v30 = vld [vmem:[%s2218_s2 + $0x58] sm:$0xff]  ;;  %1323 = vmatprep.subr.bf16.mxu1 %v1322_v19  ;;  %v1328_v31 = vpack.c.bf16 %v244_v26, %v242_v23  ;;  %v1330_v32 = vpack.c.bf16 %v249_v28, %v247_v27  ;;  %v246_v33 = vld [vmem:[%s2220_s4 + $0x40] sm:$0xff] }
   0x9   :  { %1297 = vmatpush3.bf16.msra.mxu0 %v1294_v5  ;;  %1325 = vmatpush1.bf16.msra.mxu1 %v1324_v20  ;;  %v248_v34 = vld [vmem:[%s2220_s4 + $0x50] sm:$0xff]  ;;  %v1310_v35 = vpack.c.bf16 %v65_v30, %v64_v29  ;;  %v251_v36 = vld [vmem:[%s2220_s4 + $0x68] sm:$0xff]  ;;  %v253_v37 = vld [vmem:[%s2220_s4 + $0x78] sm:$0xff] }
   0xa   :  { %1299 = vmatprep.subr.bf16.mxu0 %v1298_v8  ;;  %1327 = vmatprep.subr.bf16.mxu1 %v1326_v25  ;;  %v66_v38 = vld [vmem:[%s2218_s2 + $0x60] sm:$0xff]  ;;  %v67_v39 = vld [vmem:[%s2218_s2 + $0x68] sm:$0xff]  ;;  %v1332_v40 = vpack.c.bf16 %v248_v34, %v246_v33  ;;  %v1334_v41 = vpack.c.bf16 %v253_v37, %v251_v36  ;;  %v252_v43 = vld [vmem:[%s2220_s4 + $0x70] sm:$0xff] }
   0xb   :  { %v250_v42 = vld [vmem:[%s2220_s4 + $0x60] sm:$0xff] }
   0xd   :  { %1301 = vmatpush3.bf16.msra.mxu0 %v1298_v8  ;;  %1329 = vmatpush1.bf16.msra.mxu1 %v1328_v31 }
   0xe   :  { %1303 = vmatprep.subr.bf16.mxu0 %v1302_v12  ;;  %1331 = vmatprep.subr.bf16.mxu1 %v1330_v32 }
  0x11   :  { %1305 = vmatpush3.bf16.msra.mxu0 %v1302_v12 }
  0x12   :  { %1307 = vmatprep.subr.bf16.mxu0 %v1306_v24 }
  0x15   :  { %1309 = vmatpush3.bf16.msra.mxu0 %v1306_v24 }
  0x16   :  { %17 = vsyncpa [#allocation3], 0  ;;  %1311 = vmatprep.subr.bf16.mxu0 %v1310_v35  ;;  %v1314_v44 = vpack.c.bf16 %v67_v39, %v66_v38  ;;  %v255_v45 = vld [vmem:[%s2220_s4 + $0x88] sm:$0xff]  ;;  %v257_v46 = vld [vmem:[%s2220_s4 + $0x98] sm:$0xff]  ;;  %1333 = vmatpush1.bf16.msra.mxu1 %v1332_v40  ;;  %v1336_v49 = vpack.c.bf16 %v252_v43, %v250_v42  ;;  %v1526_v24 = vmov 0.0  }
  0x17   :  { %v68_v47 = vld [vmem:[%s2218_s2 + $0x70] sm:$0xff]  ;;  %v69_v48 = vld [vmem:[%s2218_s2 + $0x78] sm:$0xff]  ;;  %1335 = vmatprep.subr.bf16.mxu1 %v1334_v41  ;;  %v1338_v50 = vpack.c.bf16 %v257_v46, %v255_v45  ;;  %v254_v51 = vld [vmem:[%s2220_s4 + $0x80] sm:$0xff]  ;;  %346 = vmatprep.mubr.f32.mxu1 %v1526_v24 }
  0x18   :  { %v256_v52 = vld [vmem:[%s2220_s4 + $0x90] sm:$0xff]  ;;  %v1318_v53 = vpack.c.bf16 %v69_v48, %v68_v47  ;;  %v259_v54 = vld [vmem:[%s2220_s4 + $0xa8] sm:$0xff]  ;;  %v261_v55 = vld [vmem:[%s2220_s4 + $0xb8] sm:$0xff] }
  0x19   :  { %1313 = vmatpush3.bf16.msra.mxu0 %v1310_v35  ;;  %v1340_v56 = vpack.c.bf16 %v256_v52, %v254_v51  ;;  %v1342_v57 = vpack.c.bf16 %v261_v55, %v259_v54  ;;  %v258_v58 = vld [vmem:[%s2220_s4 + $0xa0] sm:$0xff]  ;;  %v260_v59 = vld [vmem:[%s2220_s4 + $0xb0] sm:$0xff]  ;;  %v263_v60 = vld [vmem:[%s2220_s4 + $0xc8] sm:$0xff] }
  0x1a   :  { %1315 = vmatprep.subr.bf16.mxu0 %v1314_v44  ;;  %1337 = vmatpush1.bf16.msra.mxu1 %v1336_v49  ;;  %v265_v61 = vld [vmem:[%s2220_s4 + $0xd8] sm:$0xff]  ;;  %v1344_v62 = vpack.c.bf16 %v260_v59, %v258_v58  ;;  %v39_v63 = vld [vmem:[%s2216_s0 + $0x8] sm:$0xff]  ;;  %v262_v1 = vld [vmem:[%s2220_s4 + $0xc0] sm:$0xff] }
  0x1b   :  { %1339 = vmatprep.subr.bf16.mxu1 %v1338_v50  ;;  %v1346_v0 = vpack.c.bf16 %v265_v61, %v263_v60  ;;  %v264_v2 = vld [vmem:[%s2220_s4 + $0xd0] sm:$0xff]  ;;  %v41_v5 = vld [vmem:[%s2216_s0 + $0x18] sm:$0xff]  ;;  %v42_v6 = vld [vmem:[%s2216_s0 + $0x20] sm:$0xff] }
  0x1c   :  { %v40_v3 = vld [vmem:[%s2216_s0 + $0x10] sm:$0xff]  ;;  %v1348_v4 = vpack.c.bf16 %v264_v2, %v262_v1  ;;  %v43_v7 = vld [vmem:[%s2216_s0 + $0x28] sm:$0xff]  ;;  %v45_v9 = vld [vmem:[%s2216_s0 + $0x38] sm:$0xff] }
  0x1d   :  { %1317 = vmatpush3.bf16.msra.mxu0 %v1314_v44  ;;  %v44_v8 = vld [vmem:[%s2216_s0 + $0x30] sm:$0xff]  ;;  %v46_v10 = vld [vmem:[%s2216_s0 + $0x40] sm:$0xff]  ;;  %v47_v11 = vld [vmem:[%s2216_s0 + $0x48] sm:$0xff] }
  0x1e   :  { %1319 = vmatprep.subr.bf16.mxu0 %v1318_v53  ;;  %1341 = vmatpush1.bf16.msra.mxu1 %v1340_v56  ;;  %v48_v12 = vld [vmem:[%s2216_s0 + $0x50] sm:$0xff]  ;;  %v49_v13 = vld [vmem:[%s2216_s0 + $0x58] sm:$0xff]  ;;  %v50_v14 = vld [vmem:[%s2216_s0 + $0x60] sm:$0xff] }
  0x1f   :  { %1343 = vmatprep.subr.bf16.mxu1 %v1342_v57  ;;  %v51_v15 = vld [vmem:[%s2216_s0 + $0x68] sm:$0xff]  ;;  %v52_v16 = vld [vmem:[%s2216_s0 + $0x70] sm:$0xff]  ;;  %v53_v17 = vld [vmem:[%s2216_s0 + $0x78] sm:$0xff] }
  0x20   :  { %v267_v18 = vld [vmem:[%s2220_s4 + $0xe8] sm:$0xff]  ;;  %v269_v19 = vld [vmem:[%s2220_s4 + $0xf8] sm:$0xff]  ;;  %v266_v21 = vld [vmem:[%s2220_s4 + $0xe0] sm:$0xff] }
  0x21   :  { %1321 = vmatpush3.bf16.msra.mxu0 %v1318_v53  ;;  %v1350_v20 = vpack.c.bf16 %v269_v19, %v267_v18  ;;  %v268_v22 = vld [vmem:[%s2220_s4 + $0xf0] sm:$0xff]  ;;  %v539_v25 = vld [vmem:[%s2222_s6] sm:$0xff]  ;;  %v540_v26 = vld [vmem:[%s2222_s6 + $0x8] sm:$0xff] }
  0x22   :  { %1345 = vmatpush1.bf16.msra.mxu1 %v1344_v62  ;;  %v1352_v23 = vpack.c.bf16 %v268_v22, %v266_v21  ;;  %v541_v27 = vld [vmem:[%s2222_s6 + $0x10] sm:$0xff]  ;;  %v1354_v28 = vpack.c.bf16 %v540_v26, %v539_v25  ;;  %v542_v29 = vld [vmem:[%s2222_s6 + $0x18] sm:$0xff]  ;;  %v1798_v31 = vld [vmem:[%s2219_s3] ss:$0 sm:$0xff] }
  0x23   :  { %1347 = vmatprep.subr.bf16.mxu1 %v1346_v0  ;;  %v1358_v30 = vpack.c.bf16 %v542_v29, %v541_v27  ;;  %v545_v19 = vld [vmem:[%s2222_s6 + $0x30] sm:$0xff]  ;;  %v547_v22 = vld [vmem:[%s2222_s6 + $0x40] sm:$0xff]  ;;  %v550_v26 = vld [vmem:[%s2222_s6 + $0x58] sm:$0xff] }
  0x24   :  { %1155 = vmatmul.mubr.f32.vlgmr.msra.gmra.mrb[0].mxu0 %v39_v63  ;;  %1355 = vmatprep.subr.bf16.mxu0 %v1354_v28  ;;  %v549_v25 = vld [vmem:[%s2222_s6 + $0x50] sm:$0xff]  ;;  %v552_v29 = vld [vmem:[%s2222_s6 + $0x68] sm:$0xff] }
  0x25   :  { %1157 = vmatprep.mubr.f32.mxu0 %v40_v3  ;;  %1357 = vmatpush3.bf16.msra.mxu0 %v1354_v28  ;;  %v1374_v27 = vpack.c.bf16 %v550_v26, %v549_v25  ;;  %v551_v28 = vld [vmem:[%s2222_s6 + $0x60] sm:$0xff] }
  0x26   :  { %1349 = vmatpush1.bf16.msra.mxu1 %v1348_v4  ;;  %1359 = vmatprep.subr.bf16.mxu0 %v1358_v30 }
  0x27   :  { %1351 = vmatprep.subr.bf16.mxu1 %v1350_v20  ;;  %v546_v20 = vld [vmem:[%s2222_s6 + $0x38] sm:$0xff] }
  0x28   :  { %1158 = vmatmul.mubr.f32.gmra.mrb[2].mxu0 %v41_v5  ;;  %v1366_v21 = vpack.c.bf16 %v546_v20, %v545_v19 }
  0x29   :  { %1160 = vmatprep.mubr.f32.mxu0 %v42_v6  ;;  %1361 = vmatpush3.bf16.msra.mxu0 %v1358_v30  ;;  %v1378_v30 = vpack.c.bf16 %v552_v29, %v551_v28 }
  0x2a   :  { %1353 = vmatpush1.bf16.msra.mxu1 %v1352_v23  ;;  %v548_v23 = vld [vmem:[%s2222_s6 + $0x48] sm:$0xff] }
  0x2c   :  { %1161 = vmatmul.mubr.f32.gmra.mrb[4].mxu0 %v43_v7 }
  0x2d   :  { %1163 = vmatprep.mubr.f32.mxu0 %v44_v8 }
  0x30   :  { %1164 = vmatmul.mubr.f32.gmra.mrb[6].mxu0 %v45_v9 }
  0x31   :  { %1166 = vmatprep.mubr.f32.mxu0 %v46_v10 }
  0x34   :  { %1167 = vmatmul.mubr.f32.gmra.mrb[8].mxu0 %v47_v11 }
  0x35   :  { %1169 = vmatprep.mubr.f32.mxu0 %v48_v12 }
  0x38   :  { %1170 = vmatmul.mubr.f32.gmra.mrb[10].mxu0 %v49_v13 }
  0x39   :  { %1172 = vmatprep.mubr.f32.mxu0 %v50_v14 }
  0x3c   :  { %1173 = vmatmul.mubr.f32.gmra.mrb[12].mxu0 %v51_v15 }
  0x3d   :  { %1175 = vmatprep.mubr.f32.mxu0 %v52_v16  ;;  %v543_v16 = vld [vmem:[%s2222_s6 + $0x20] sm:$0xff] }
  0x40   :  { %1176 = vmatmul.mubr.f32.gmra.mrb[14].mxu0 %v53_v17  ;;  %v544_v17 = vld [vmem:[%s2222_s6 + $0x28] sm:$0xff] }
  0x41   :  { %v1362_v18 = vpack.c.bf16 %v544_v17, %v543_v16 }
  0x43   :  { %1363 = vmatprep.subr.bf16.mxu0 %v1362_v18 }
  0x44   :  { %1365 = vmatpush3.bf16.msra.mxu0 %v1362_v18 }
  0x45   :  { %1367 = vmatprep.subr.bf16.mxu0 %v1366_v21 }
  0x48   :  { %1369 = vmatpush3.bf16.msra.mxu0 %v1366_v21 }
  0xf7   :  { %v1156_v32 = vpop.f32.mrb[0].mxu0 }
  0xf8   :  { %v143_v33 = vpop.f32.mrb[1].mxu0  ;;  %v149_v35 = vadd.f32 %v1156_v32, %v1798_v31  ;;  %v554_v32 = vld [vmem:[%s2222_s6 + $0x78] sm:$0xff] }
  0xf9   :  { %v144_v34 = vadd.f32 %v1798_v31, %v143_v33 }
  0xfa   :  { %v223_v40 = vmax.f32 %v149_v35, 0.0  ;;  %v724_v35 = vld [vmem:[%s2224_s8 + $0x8] sm:$0xff] }
  0xfb   :  { %v222_v36 = vmax.f32 %v144_v34, 0.0  ;;  %v1159_v37 = vpop.f32.mrb[2].mxu0  ;;  %v723_v34 = vld [vmem:[%s2224_s8] sm:$0xff] }
  0xfc   :  { %v153_v38 = vpop.f32.mrb[3].mxu0  ;;  %v159_v44 = vadd.f32 %v1159_v37, %v1798_v31  ;;  %v1876_v37 = vpack.c.bf16 %v724_v35, %v723_v34 }
  0xfd   :  { %347 = vmatmul.mubr.f32.vlgmr.msra.gmra.mrb[0].mxu1 %v222_v36  ;;  %v154_v39 = vadd.f32 %v1798_v31, %v153_v38  ;;  %v725_v36 = vld [vmem:[%s2224_s8 + $0x10] sm:$0xff]  ;;  %v726_v38 = vld [vmem:[%s2224_s8 + $0x18] sm:$0xff] }
  0xfe   :  { %352 = vmatprep.mubr.f32.mxu1 %v1526_v24  ;;  %v225_v48 = vmax.f32 %v159_v44, 0.0  ;;  %1418 = vmatprep.subr.bf16.mxu1 %v1876_v37  ;;  %v730_v44 = vld [vmem:[%s2224_s8 + $0x38] sm:$0xff] }
  0xff   :  { %v1162_v41 = vpop.f32.mrb[4].mxu0  ;;  %v224_v43 = vmax.f32 %v154_v39, 0.0  ;;  %v1882_v39 = vpack.c.bf16 %v726_v38, %v725_v36  ;;  %1426 = vmatpush3.bf16.msra.mxu1 %v1876_v37 }
 0x100   :  { %v163_v42 = vpop.f32.mrb[5].mxu0  ;;  %v169_v52 = vadd.f32 %v1162_v41, %v1798_v31  ;;  %v728_v41 = vld [vmem:[%s2224_s8 + $0x28] sm:$0xff] }
 0x101   :  { %353 = vmatmul.mubr.f32.gmra.mrb[2].mxu1 %v223_v40  ;;  %v164_v47 = vadd.f32 %v1798_v31, %v163_v42  ;;  %v727_v40 = vld [vmem:[%s2224_s8 + $0x20] sm:$0xff]  ;;  %1419 = vmatprep.subr.bf16.mxu1 %v1882_v39 }
 0x102   :  { %358 = vmatprep.mubr.f32.mxu1 %v1526_v24  ;;  %v227_v56 = vmax.f32 %v169_v52, 0.0  ;;  %v1893_v42 = vpack.c.bf16 %v728_v41, %v727_v40  ;;  %v735_v52 = vld [vmem:[%s2224_s8 + $0x60] sm:$0xff] }
 0x103   :  { %v1165_v45 = vpop.f32.mrb[6].mxu0  ;;  %v226_v51 = vmax.f32 %v164_v47, 0.0  ;;  %1427 = vmatpush3.bf16.msra.mxu1 %v1882_v39  ;;  %v732_v47 = vld [vmem:[%s2224_s8 + $0x48] sm:$0xff] }
 0x104   :  { %v173_v46 = vpop.f32.mrb[7].mxu0  ;;  %v179_v60 = vadd.f32 %v1165_v45, %v1798_v31  ;;  %1420 = vmatprep.subr.bf16.mxu1 %v1893_v42 }
 0x105   :  { %359 = vmatmul.mubr.f32.gmra.mrb[4].mxu1 %v224_v43  ;;  %v174_v55 = vadd.f32 %v1798_v31, %v173_v46  ;;  %v729_v43 = vld [vmem:[%s2224_s8 + $0x30] sm:$0xff]  ;;  %v731_v46 = vld [vmem:[%s2224_s8 + $0x40] sm:$0xff] }
 0x106   :  { %364 = vmatprep.mubr.f32.mxu1 %v1526_v24  ;;  %v229_v0 = vmax.f32 %v179_v60, 0.0  ;;  %v1903_v45 = vpack.c.bf16 %v730_v44, %v729_v43  ;;  %v445_v44 = vld [vmem:[%s2217_s1 + $0x10] sm:$0xff] }
 0x107   :  { %v1168_v49 = vpop.f32.mrb[8].mxu0  ;;  %v228_v59 = vmax.f32 %v174_v55, 0.0  ;;  %1428 = vmatpush3.bf16.msra.mxu1 %v1893_v42  ;;  %v272_v55 = vlaneseq }
 0x108   :  { %v183_v50 = vpop.f32.mrb[9].mxu0  ;;  %v189_v2 = vadd.f32 %v1168_v49, %v1798_v31  ;;  %1421 = vmatprep.subr.bf16.mxu1 %v1903_v45  ;;  %v733_v49 = vld [vmem:[%s2224_s8 + $0x50] sm:$0xff] }
 0x109   :  { %365 = vmatmul.mubr.f32.gmra.mrb[6].mxu1 %v225_v48  ;;  %v184_v63 = vadd.f32 %v1798_v31, %v183_v50  ;;  %v1913_v48 = vpack.c.bf16 %v732_v47, %v731_v46  ;;  %v734_v50 = vld [vmem:[%s2224_s8 + $0x58] sm:$0xff] }
 0x10a   :  { %370 = vmatprep.mubr.f32.mxu1 %v1526_v24  ;;  %v231_v4 = vmax.f32 %v189_v2, 0.0 }
 0x10b   :  { %v1171_v53 = vpop.f32.mrb[10].mxu0  ;;  %v230_v1 = vmax.f32 %v184_v63, 0.0  ;;  %1429 = vmatpush3.bf16.msra.mxu1 %v1903_v45 }
 0x10c   :  { %v193_v54 = vpop.f32.mrb[11].mxu0  ;;  %v199_v6 = vadd.f32 %v1171_v53, %v1798_v31  ;;  %1422 = vmatprep.subr.bf16.mxu1 %v1913_v48  ;;  %v736_v53 = vld [vmem:[%s2224_s8 + $0x68] sm:$0xff] }
 0x10d   :  { %371 = vmatmul.mubr.f32.gmra.mrb[8].mxu1 %v226_v51  ;;  %v194_v3 = vadd.f32 %v1798_v31, %v193_v54  ;;  %v1923_v51 = vpack.c.bf16 %v734_v50, %v733_v49  ;;  %v1933_v54 = vpack.c.bf16 %v736_v53, %v735_v52 }
 0x10e   :  { %376 = vmatprep.mubr.f32.mxu1 %v1526_v24  ;;  %v233_v8 = vmax.f32 %v199_v6, 0.0 }
 0x10f   :  { %v1174_v57 = vpop.f32.mrb[12].mxu0  ;;  %v232_v5 = vmax.f32 %v194_v3, 0.0  ;;  %1430 = vmatpush3.bf16.msra.mxu1 %v1913_v48 }
 0x110   :  { %v203_v58 = vpop.f32.mrb[13].mxu0  ;;  %v209_v10 = vadd.f32 %v1174_v57, %v1798_v31  ;;  %1423 = vmatprep.subr.bf16.mxu1 %v1923_v51 }
 0x111   :  { %377 = vmatmul.mubr.f32.gmra.mrb[10].mxu1 %v227_v56  ;;  %v204_v7 = vadd.f32 %v1798_v31, %v203_v58  ;;  %v273_v56 = vshrl.u32 %v272_v55, 7  ;;  %v270_v58 = vld [vmem:[%s2221_s5] sm:$0x3] }
 0x112   :  { %382 = vmatprep.mubr.f32.mxu1 %v1526_v24  ;;  %v235_v12 = vmax.f32 %v209_v10, 0.0 }
 0x113   :  { %v1177_v61 = vpop.f32.mrb[14].mxu0  ;;  %v234_v9 = vmax.f32 %v204_v7, 0.0  ;;  %1431 = vmatpush3.bf16.msra.mxu1 %v1923_v51  ;;  %v274_v57 = vsub.s32 0, %v273_v56 }
 0x114   :  { %v213_v62 = vpop.f32.mrb[15].mxu0  ;;  %v219_v14 = vadd.f32 %v1177_v61, %v1798_v31  ;;  %1424 = vmatprep.subr.bf16.mxu1 %v1933_v54 }
 0x115   :  { %383 = vmatmul.mubr.f32.gmra.mrb[12].mxu1 %v228_v59  ;;  %v214_v11 = vadd.f32 %v1798_v31, %v213_v62  ;;  %v553_v31 = vld [vmem:[%s2222_s6 + $0x70] sm:$0xff]  ;;  %v278_v59 = vsub.s32 1, %v273_v56  ;;  %v1941_v60 = vrot.slane %v270_v58, %v274_v57 }
 0x116   :  { %388 = vmatprep.mubr.f32.mxu1 %v1526_v24  ;;  %v237_v15 = vmax.f32 %v219_v14, 0.0  ;;  %v1382_v33 = vpack.c.bf16 %v554_v32, %v553_v31  ;;  %v444_v31 = vld [vmem:[%s2217_s1 + $0x8] sm:$0xff] }
 0x117   :  { %v236_v13 = vmax.f32 %v214_v11, 0.0  ;;  %1432 = vmatpush3.bf16.msra.mxu1 %v1933_v54  ;;  %v1943_v61 = vrot.slane %v270_v58, %v278_v59  ;;  %v446_v58 = vld [vmem:[%s2217_s1 + $0x18] sm:$0xff] }
 0x119   :  { %389 = vmatmul.mubr.f32.gmra.mrb[14].mxu1 %v229_v0 }
 0x11a   :  { %394 = vmatprep.mubr.f32.mxu1 %v1526_v24 }
 0x11d   :  { %395 = vmatmul.mubr.f32.gmra.mrb[16].mxu1 %v230_v1 }
 0x11e   :  { %400 = vmatprep.mubr.f32.mxu1 %v1526_v24 }
 0x121   :  { %401 = vmatmul.mubr.f32.gmra.mrb[18].mxu1 %v231_v4 }
 0x122   :  { %406 = vmatprep.mubr.f32.mxu1 %v1526_v24 }
 0x125   :  { %407 = vmatmul.mubr.f32.gmra.mrb[20].mxu1 %v232_v5 }
 0x126   :  { %412 = vmatprep.mubr.f32.mxu1 %v1526_v24 }
 0x129   :  { %413 = vmatmul.mubr.f32.gmra.mrb[22].mxu1 %v233_v8 }
 0x12a   :  { %418 = vmatprep.mubr.f32.mxu1 %v1526_v24 }
 0x12d   :  { %419 = vmatmul.mubr.f32.gmra.mrb[24].mxu1 %v234_v9 }
 0x12e   :  { %424 = vmatprep.mubr.f32.mxu1 %v1526_v24 }
 0x131   :  { %425 = vmatmul.mubr.f32.gmra.mrb[26].mxu1 %v235_v12 }
 0x132   :  { %430 = vmatprep.mubr.f32.mxu1 %v1526_v24 }
 0x135   :  { %431 = vmatmul.mubr.f32.gmra.mrb[28].mxu1 %v236_v13 }
 0x136   :  { %436 = vmatprep.mubr.f32.mxu1 %v1526_v24  ;;  %v1370_v24 = vpack.c.bf16 %v548_v23, %v547_v22  ;;  %v443_v22 = vld [vmem:[%s2217_s1] sm:$0xff] }
 0x138   :  { %1371 = vmatprep.subr.bf16.mxu0 %v1370_v24 }
 0x139   :  { %437 = vmatmul.mubr.f32.gmra.mrb[30].mxu1 %v237_v15  ;;  %1373 = vmatpush3.bf16.msra.mxu0 %v1370_v24 }
 0x13a   :  { %1375 = vmatprep.subr.bf16.mxu0 %v1374_v27 }
 0x13d   :  { %1377 = vmatpush3.bf16.msra.mxu0 %v1374_v27 }
 0x13e   :  { %1379 = vmatprep.subr.bf16.mxu0 %v1378_v30 }
 0x141   :  { %1381 = vmatpush3.bf16.msra.mxu0 %v1378_v30 }
 0x142   :  { %1383 = vmatprep.subr.bf16.mxu0 %v1382_v33 }
 0x145   :  { %1385 = vmatpush3.bf16.msra.mxu0 %v1382_v33 }
 0x146   :  { %1387 = vmatprep.subr.bf16.mxu0 %v1876_v37 }
 0x1d0   :  { %v348_v62 = vpop.f32.mrb[0].mxu1 }
 0x1d1   :  { %v349_v63 = vadd.f32 %v348_v62, %v1941_v60  ;;  %v350_v0 = vpop.f32.mrb[1].mxu1 }
 0x1d2   :  { %v351_v1 = vadd.f32 %v350_v0, %v1943_v61 }
 0x1d3   :  { %971 = vst [vmem:[%s2227_s11] sm:$0xff] %v349_v63 }
 0x1d4   :  { %v459_v2 = vmul.f32 0.5, %v351_v1  ;;  %972 = vst [vmem:[%s2227_s11 + $0x8] sm:$0xff] %v351_v1  ;;  %v354_v3 = vpop.f32.mrb[2].mxu1 }
 0x1d5   :  { %v355_v4 = vadd.f32 %v354_v3, %v1941_v60  ;;  %v356_v5 = vpop.f32.mrb[3].mxu1 }
 0x1d6   :  { %v475_v6 = vmul.f32 1.442695, %v459_v2  ;;  %v357_v7 = vadd.f32 %v356_v5, %v1943_v61  ;;  %v447_v5 = vld [vmem:[%s2217_s1 + $0x20] sm:$0xff] }
 0x1d7   :  { %973 = vst [vmem:[%s2227_s11 + $0x10] sm:$0xff] %v355_v4 }
 0x1d8   :  { %1438 = vpow2.f32 %v475_v6  ;;  %v460_v8 = vmul.f32 0.5, %v357_v7  ;;  %974 = vst [vmem:[%s2227_s11 + $0x18] sm:$0xff] %v357_v7  ;;  %v360_v9 = vpop.f32.mrb[4].mxu1 }
 0x1d9   :  { %v361_v10 = vadd.f32 %v360_v9, %v1941_v60  ;;  %v362_v11 = vpop.f32.mrb[5].mxu1 }
 0x1da   :  { %v477_v12 = vmul.f32 1.442695, %v460_v8  ;;  %v363_v13 = vadd.f32 %v362_v11, %v1943_v61 }
 0x1db   :  { %975 = vst [vmem:[%s2227_s11 + $0x20] sm:$0xff] %v361_v10 }
 0x1dc   :  { %1440 = vpow2.f32 %v477_v12  ;;  %v461_v14 = vmul.f32 0.5, %v363_v13  ;;  %976 = vst [vmem:[%s2227_s11 + $0x28] sm:$0xff] %v363_v13  ;;  %v366_v15 = vpop.f32.mrb[6].mxu1 }
 0x1dd   :  { %v1970_v16 = vadd.f32 %v366_v15, %v1941_v60  ;;  %v368_v17 = vpop.f32.mrb[7].mxu1 }
 0x1de   :  { %v479_v18 = vmul.f32 1.442695, %v461_v14  ;;  %v369_v19 = vadd.f32 %v368_v17, %v1943_v61  ;;  %v448_v14 = vld [vmem:[%s2217_s1 + $0x28] sm:$0xff] }
 0x1df   :  { %977 = vst [vmem:[%s2227_s11 + $0x30] sm:$0xff] %v1970_v16 }
 0x1e0   :  { %1442 = vpow2.f32 %v479_v18  ;;  %v462_v20 = vmul.f32 0.5, %v369_v19  ;;  %978 = vst [vmem:[%s2227_s11 + $0x38] sm:$0xff] %v369_v19  ;;  %v372_v21 = vpop.f32.mrb[8].mxu1 }
 0x1e1   :  { %v1984_v23 = vadd.f32 %v372_v21, %v1941_v60  ;;  %v374_v24 = vpop.f32.mrb[9].mxu1 }
 0x1e2   :  { %v1439_v25 = vpop.eup %1438  ;;  %v481_v26 = vmul.f32 1.442695, %v462_v20  ;;  %v375_v27 = vadd.f32 %v374_v24, %v1943_v61 }
 0x1e3   :  { %979 = vst [vmem:[%s2227_s11 + $0x40] sm:$0xff] %v1984_v23  ;;  %v507_v28 = vmul.f32 %v1439_v25, %v443_v22 }
 0x1e4   :  { %1444 = vpow2.f32 %v481_v26  ;;  %v463_v29 = vmul.f32 0.5, %v375_v27  ;;  %980 = vst [vmem:[%s2227_s11 + $0x48] sm:$0xff] %v375_v27  ;;  %v378_v30 = vpop.f32.mrb[10].mxu1 }
 0x1e5   :  { %v1998_v32 = vadd.f32 %v378_v30, %v1941_v60  ;;  %v380_v33 = vpop.f32.mrb[11].mxu1  ;;  %v523_v34 = vadd.f32 %v507_v28, %v349_v63 }
 0x1e6   :  { %v1441_v35 = vpop.eup %1440  ;;  %v483_v36 = vmul.f32 1.442695, %v463_v29  ;;  %v381_v38 = vadd.f32 %v380_v33, %v1943_v61 }
 0x1e7   :  { %981 = vst [vmem:[%s2227_s11 + $0x50] sm:$0xff] %v1998_v32  ;;  %1210 = vmatprep.mubr.f32.mxu0 %v523_v34  ;;  %v508_v40 = vmul.f32 %v1441_v35, %v444_v31 }
 0x1e8   :  { %1446 = vpow2.f32 %v483_v36  ;;  %v464_v41 = vmul.f32 0.5, %v381_v38  ;;  %982 = vst [vmem:[%s2227_s11 + $0x58] sm:$0xff] %v381_v38  ;;  %v384_v43 = vpop.f32.mrb[12].mxu1 }
 0x1e9   :  { %v2012_v46 = vadd.f32 %v384_v43, %v1941_v60  ;;  %v386_v47 = vpop.f32.mrb[13].mxu1  ;;  %v524_v49 = vadd.f32 %v508_v40, %v355_v4 }
 0x1ea   :  { %v1443_v50 = vpop.eup %1442  ;;  %v485_v52 = vmul.f32 1.442695, %v464_v41  ;;  %v387_v53 = vadd.f32 %v386_v47, %v1943_v61 }
 0x1eb   :  { %983 = vst [vmem:[%s2227_s11 + $0x60] sm:$0xff] %v2012_v46  ;;  %1211 = vmatmul.mubr.f32.vlgmr.msra.gmra.mrb[16].mxu0 %v524_v49  ;;  %v509_v55 = vmul.f32 %v1443_v50, %v445_v44  ;;  %v451_v44 = vld [vmem:[%s2217_s1 + $0x40] sm:$0xff] }
 0x1ec   :  { %1448 = vpow2.f32 %v485_v52  ;;  %v465_v56 = vmul.f32 0.5, %v387_v53  ;;  %984 = vst [vmem:[%s2227_s11 + $0x68] sm:$0xff] %v387_v53  ;;  %v390_v57 = vpop.f32.mrb[14].mxu1  ;;  %1389 = vmatpush3.bf16.msra.mxu0 %v1876_v37 }
 0x1ed   :  { %v2027_v59 = vadd.f32 %v390_v57, %v1941_v60  ;;  %v392_v62 = vpop.f32.mrb[15].mxu1  ;;  %v525_v63 = vadd.f32 %v509_v55, %v361_v10  ;;  %1391 = vmatprep.subr.bf16.mxu0 %v1882_v39  ;;  %v452_v57 = vld [vmem:[%s2217_s1 + $0x48] sm:$0xff] }
 0x1ee   :  { %v1445_v0 = vpop.eup %1444  ;;  %v487_v1 = vmul.f32 1.442695, %v465_v56  ;;  %v393_v2 = vadd.f32 %v392_v62, %v1943_v61 }
 0x1ef   :  { %985 = vst [vmem:[%s2227_s11 + $0x70] sm:$0xff] %v2027_v59  ;;  %1213 = vmatprep.mubr.f32.mxu0 %v525_v63  ;;  %v510_v3 = vmul.f32 %v1445_v0, %v446_v58 }
 0x1f0   :  { %1450 = vpow2.f32 %v487_v1  ;;  %v466_v37 = vmul.f32 0.5, %v393_v2  ;;  %986 = vst [vmem:[%s2227_s11 + $0x78] sm:$0xff] %v393_v2  ;;  %v396_v4 = vpop.f32.mrb[16].mxu1  ;;  %1393 = vmatpush3.bf16.msra.mxu0 %v1882_v39 }
 0x1f1   :  { %v2043_v6 = vadd.f32 %v396_v4, %v1941_v60  ;;  %v398_v7 = vpop.f32.mrb[17].mxu1  ;;  %v526_v8 = vadd.f32 %v510_v3, %v1970_v16  ;;  %1395 = vmatprep.subr.bf16.mxu0 %v1893_v42 }
 0x1f2   :  { %v1447_v9 = vpop.eup %1446  ;;  %v489_v10 = vmul.f32 1.442695, %v466_v37  ;;  %v399_v11 = vadd.f32 %v398_v7, %v1943_v61  ;;  %v453_v37 = vld [vmem:[%s2217_s1 + $0x50] sm:$0xff] }
 0x1f3   :  { %987 = vst [vmem:[%s2227_s11 + $0x80] sm:$0xff] %v2043_v6  ;;  %1214 = vmatmul.mubr.f32.gmra.mrb[18].mxu0 %v526_v8  ;;  %v511_v12 = vmul.f32 %v1447_v9, %v447_v5 }
 0x1f4   :  { %1452 = vpow2.f32 %v489_v10  ;;  %v467_v39 = vmul.f32 0.5, %v399_v11  ;;  %988 = vst [vmem:[%s2227_s11 + $0x88] sm:$0xff] %v399_v11  ;;  %v402_v13 = vpop.f32.mrb[18].mxu1  ;;  %1397 = vmatpush3.bf16.msra.mxu0 %v1893_v42 }
 0x1f5   :  { %v2060_v15 = vadd.f32 %v402_v13, %v1941_v60  ;;  %v404_v16 = vpop.f32.mrb[19].mxu1  ;;  %v527_v17 = vadd.f32 %v511_v12, %v1984_v23  ;;  %1399 = vmatprep.subr.bf16.mxu0 %v1903_v45  ;;  %v449_v23 = vld [vmem:[%s2217_s1 + $0x30] sm:$0xff] }
 0x1f6   :  { %v1449_v18 = vpop.eup %1448  ;;  %v491_v19 = vmul.f32 1.442695, %v467_v39  ;;  %v405_v20 = vadd.f32 %v404_v16, %v1943_v61  ;;  %v454_v39 = vld [vmem:[%s2217_s1 + $0x58] sm:$0xff] }
 0x1f7   :  { %989 = vst [vmem:[%s2227_s11 + $0x90] sm:$0xff] %v2060_v15  ;;  %1216 = vmatprep.mubr.f32.mxu0 %v527_v17  ;;  %v512_v21 = vmul.f32 %v1449_v18, %v448_v14 }
 0x1f8   :  { %1454 = vpow2.f32 %v491_v19  ;;  %v468_v42 = vmul.f32 0.5, %v405_v20  ;;  %990 = vst [vmem:[%s2227_s11 + $0x98] sm:$0xff] %v405_v20  ;;  %v408_v22 = vpop.f32.mrb[20].mxu1  ;;  %1401 = vmatpush3.bf16.msra.mxu0 %v1903_v45 }
 0x1f9   :  { %v2077_v24 = vadd.f32 %v408_v22, %v1941_v60  ;;  %v410_v25 = vpop.f32.mrb[21].mxu1  ;;  %v528_v26 = vadd.f32 %v512_v21, %v1998_v32  ;;  %1403 = vmatprep.subr.bf16.mxu0 %v1913_v48  ;;  %v450_v32 = vld [vmem:[%s2217_s1 + $0x38] sm:$0xff] }
 0x1fa   :  { %v1451_v27 = vpop.eup %1450  ;;  %v493_v28 = vmul.f32 1.442695, %v468_v42  ;;  %v411_v29 = vadd.f32 %v410_v25, %v1943_v61 }
 0x1fb   :  { %991 = vst [vmem:[%s2227_s11 + $0xa0] sm:$0xff] %v2077_v24  ;;  %1217 = vmatmul.mubr.f32.gmra.mrb[20].mxu0 %v528_v26  ;;  %v513_v30 = vmul.f32 %v1451_v27, %v449_v23  ;;  %v456_v23 = vld [vmem:[%s2217_s1 + $0x68] sm:$0xff]  ;;  %v457_v27 = vld [vmem:[%s2217_s1 + $0x70] sm:$0xff] }
 0x1fc   :  { %1456 = vpow2.f32 %v493_v28  ;;  %v469_v45 = vmul.f32 0.5, %v411_v29  ;;  %992 = vst [vmem:[%s2227_s11 + $0xa8] sm:$0xff] %v411_v29  ;;  %v414_v31 = vpop.f32.mrb[22].mxu1  ;;  %1405 = vmatpush3.bf16.msra.mxu0 %v1913_v48 }
 0x1fd   :  { %v2094_v33 = vadd.f32 %v414_v31, %v1941_v60  ;;  %v416_v34 = vpop.f32.mrb[23].mxu1  ;;  %v529_v35 = vadd.f32 %v513_v30, %v2012_v46  ;;  %1407 = vmatprep.subr.bf16.mxu0 %v1923_v51 }
 0x1fe   :  { %v1453_v36 = vpop.eup %1452  ;;  %v495_v38 = vmul.f32 1.442695, %v469_v45  ;;  %v417_v40 = vadd.f32 %v416_v34, %v1943_v61  ;;  %v458_v45 = vld [vmem:[%s2217_s1 + $0x78] sm:$0xff] }
 0x1ff   :  { %993 = vst [vmem:[%s2227_s11 + $0xb0] sm:$0xff] %v2094_v33  ;;  %1219 = vmatprep.mubr.f32.mxu0 %v529_v35  ;;  %v514_v41 = vmul.f32 %v1453_v36, %v450_v32  ;;  %v737_v35 = vld [vmem:[%s2224_s8 + $0x70] sm:$0xff]  ;;  %v738_v36 = vld [vmem:[%s2224_s8 + $0x78] sm:$0xff] }
 0x200   :  { %1458 = vpow2.f32 %v495_v38  ;;  %v470_v48 = vmul.f32 0.5, %v417_v40  ;;  %994 = vst [vmem:[%s2227_s11 + $0xb8] sm:$0xff] %v417_v40  ;;  %v420_v43 = vpop.f32.mrb[24].mxu1  ;;  %1409 = vmatpush3.bf16.msra.mxu0 %v1923_v51  ;;  %v1414_v38 = vpack.c.bf16 %v738_v36, %v737_v35  ;;  %v1024_v40 = vld [vmem:[%s2223_s7] ss:$0 sm:$0xff] }
 0x201   :  { %v2111_v46 = vadd.f32 %v420_v43, %v1941_v60  ;;  %v422_v47 = vpop.f32.mrb[25].mxu1  ;;  %v530_v49 = vadd.f32 %v514_v41, %v2027_v59  ;;  %1411 = vmatprep.subr.bf16.mxu0 %v1933_v54 }
 0x202   :  { %v1455_v50 = vpop.eup %1454  ;;  %v497_v52 = vmul.f32 1.442695, %v470_v48  ;;  %v423_v53 = vadd.f32 %v422_v47, %v1943_v61  ;;  %1425 = vmatprep.subr.bf16.mxu1 %v1414_v38 }
 0x203   :  { %995 = vst [vmem:[%s2227_s11 + $0xc0] sm:$0xff] %v2111_v46  ;;  %1220 = vmatmul.mubr.f32.gmra.mrb[22].mxu0 %v530_v49  ;;  %v515_v55 = vmul.f32 %v1455_v50, %v451_v44  ;;  %1433 = vmatpush3.bf16.msra.mxu1 %v1414_v38 }
 0x204   :  { %1460 = vpow2.f32 %v497_v52  ;;  %v471_v51 = vmul.f32 0.5, %v423_v53  ;;  %996 = vst [vmem:[%s2227_s11 + $0xc8] sm:$0xff] %v423_v53  ;;  %v426_v56 = vpop.f32.mrb[26].mxu1  ;;  %1413 = vmatpush3.bf16.msra.mxu0 %v1933_v54 }
 0x205   :  { %v427_v58 = vadd.f32 %v426_v56, %v1941_v60  ;;  %v428_v59 = vpop.f32.mrb[27].mxu1  ;;  %v531_v62 = vadd.f32 %v515_v55, %v2043_v6  ;;  %1415 = vmatprep.subr.bf16.mxu0 %v1414_v38 }
 0x206   :  { %v1457_v63 = vpop.eup %1456  ;;  %v499_v0 = vmul.f32 1.442695, %v471_v51  ;;  %v429_v1 = vadd.f32 %v428_v59, %v1943_v61 }
 0x207   :  { %997 = vst [vmem:[%s2227_s11 + $0xd0] sm:$0xff] %v427_v58  ;;  %1222 = vmatprep.mubr.f32.mxu0 %v531_v62  ;;  %v516_v2 = vmul.f32 %v1457_v63, %v452_v57 }
 0x208   :  { %1462 = vpow2.f32 %v499_v0  ;;  %v472_v3 = vmul.f32 0.5, %v429_v1  ;;  %998 = vst [vmem:[%s2227_s11 + $0xd8] sm:$0xff] %v429_v1  ;;  %v432_v54 = vpop.f32.mrb[28].mxu1  ;;  %1417 = vmatpush3.bf16.msra.mxu0 %v1414_v38 }
 0x209   :  { %v433_v4 = vadd.f32 %v432_v54, %v1941_v60  ;;  %v434_v5 = vpop.f32.mrb[29].mxu1  ;;  %v532_v6 = vadd.f32 %v516_v2, %v2060_v15 }
 0x20a   :  { %v1459_v7 = vpop.eup %1458  ;;  %v501_v8 = vmul.f32 1.442695, %v472_v3  ;;  %v435_v9 = vadd.f32 %v434_v5, %v1943_v61 }
 0x20b   :  { %999 = vst [vmem:[%s2227_s11 + $0xe0] sm:$0xff] %v433_v4  ;;  %1223 = vmatmul.mubr.f32.gmra.mrb[24].mxu0 %v532_v6  ;;  %v517_v10 = vmul.f32 %v1459_v7, %v453_v37 }
 0x20c   :  { %1464 = vpow2.f32 %v501_v8  ;;  %v473_v11 = vmul.f32 0.5, %v435_v9  ;;  %1000 = vst [vmem:[%s2227_s11 + $0xe8] sm:$0xff] %v435_v9  ;;  %v438_v12 = vpop.f32.mrb[30].mxu1 }
 0x20d   :  { %v439_v13 = vadd.f32 %v438_v12, %v1941_v60  ;;  %v440_v14 = vpop.f32.mrb[31].mxu1  ;;  %v533_v15 = vadd.f32 %v517_v10, %v2077_v24  ;;  %v455_v60 = vld [vmem:[%s2217_s1 + $0x60] sm:$0xff] }
 0x20e   :  { %v1461_v16 = vpop.eup %1460  ;;  %v503_v17 = vmul.f32 1.442695, %v473_v11  ;;  %v441_v18 = vadd.f32 %v440_v14, %v1943_v61 }
 0x20f   :  { %1001 = vst [vmem:[%s2227_s11 + $0xf0] sm:$0xff] %v439_v13  ;;  %1225 = vmatprep.mubr.f32.mxu0 %v533_v15  ;;  %v518_v19 = vmul.f32 %v1461_v16, %v454_v39 }
 0x210   :  { %1466 = vpow2.f32 %v503_v17  ;;  %v474_v20 = vmul.f32 0.5, %v441_v18  ;;  %1002 = vst [vmem:[%s2227_s11 + $0xf8] sm:$0xff] %v441_v18 }
 0x211   :  { %v534_v21 = vadd.f32 %v518_v19, %v2094_v33 }
 0x212   :  { %v1463_v42 = vpop.eup %1462  ;;  %v505_v61 = vmul.f32 1.442695, %v474_v20 }
 0x213   :  { %1226 = vmatmul.mubr.f32.gmra.mrb[26].mxu0 %v534_v21  ;;  %v519_v22 = vmul.f32 %v1463_v42, %v455_v60 }
 0x214   :  { %1468 = vpow2.f32 %v505_v61 }
 0x215   :  { %v535_v24 = vadd.f32 %v519_v22, %v2111_v46 }
 0x216   :  { %v1465_v25 = vpop.eup %1464 }
 0x217   :  { %1228 = vmatprep.mubr.f32.mxu0 %v535_v24  ;;  %v520_v26 = vmul.f32 %v1465_v25, %v456_v23  ;;  %v2186_v24 = vld [vmem:[%s2225_s9] ss:$0 sm:$0xff]  ;;  %s1527_s9 = smov [#allocation2]  }
 0x218   :  { %s1008_s22 = sshll.u32 %s1527_s9, 4  ;;  %s1009_s22 = int_to_ptr.vmem [resolvable:$true] %s1008_s22 }
 0x219   :  { %v536_v28 = vadd.f32 %v520_v26, %v427_v58  ;;  %s1502_s23 = scalar_lea.vmem %s1009_s22, 2048  ;;  %p1507_p1 = scmp.lt.s32.totalorder %s1009_s22, %s1009_s22 }
 0x21a   :  { %v1467_v29 = vpop.eup %1466  ;;  %p1503_p0 = scmp.ne.s32.totalorder %s1009_s22, %s1502_s23  ;;  %p1508_p2 = scmp.lt.s32.totalorder %s1502_s23, %s1502_s23 }
 0x21b   :  { %1229 = vmatmul.mubr.f32.gmra.mrb[28].mxu0 %v536_v28  ;;  %v521_v30 = vmul.f32 %v1467_v29, %v457_v27 }
 0x21c   :  { %p1509_p3 = por %p1508_p2, %p1507_p1 }
 0x21d   :  { %v537_v31 = vadd.f32 %v521_v30, %v433_v4 }
 0x21e   :  { %v1469_v32 = vpop.eup %1468  ;;  %p1510_p4 = pnand %p1509_p3, %p1503_p0 }
 0x21f   :  { %1231 = vmatprep.mubr.f32.mxu0 %v537_v31  ;;  %v522_v33 = vmul.f32 %v1469_v32, %v458_v45 }
 0x221   :  { %v538_v34 = vadd.f32 %v522_v33, %v439_v13 }
 0x223   :  { %1232 = vmatmul.mubr.f32.gmra.mrb[30].mxu0 %v538_v34 }
 0x2be   :  { %v1212_v41 = vpop.f32.mrb[16].mxu0 }
 0x2bf   :  { %v634_v48 = vadd.f32 %v1212_v41, %v1024_v40  ;;  %v628_v43 = vpop.f32.mrb[17].mxu0 }
 0x2c0   :  { %v629_v44 = vadd.f32 %v1024_v40, %v628_v43 }
 0x2c1   :  { %v708_v47 = vmax.f32 %v634_v48, 0.0 }
 0x2c2   :  { %v707_v46 = vmax.f32 %v629_v44, 0.0 }
 0x2c4   :  { %1266 = vmatprep.mubr.f32.mxu0 %v707_v46 }
 0x2c5   :  { %1267 = vmatmul.mubr.f32.vlgmr.msra.gmra.mrb[32].mxu0 %v708_v47 }
 0x2c6   :  { %v1215_v49 = vpop.f32.mrb[18].mxu0 }
 0x2c7   :  { %v644_v50 = vadd.f32 %v1215_v49, %v1024_v40  ;;  %v638_v52 = vpop.f32.mrb[19].mxu0 }
 0x2c8   :  { %v639_v53 = vadd.f32 %v1024_v40, %v638_v52 }
 0x2c9   :  { %v710_v51 = vmax.f32 %v644_v50, 0.0 }
 0x2ca   :  { %v709_v55 = vmax.f32 %v639_v53, 0.0 }
 0x2cc   :  { %1269 = vmatprep.mubr.f32.mxu0 %v709_v55 }
 0x2cd   :  { %1270 = vmatmul.mubr.f32.gmra.mrb[34].mxu0 %v710_v51 }
 0x2ce   :  { %v1218_v56 = vpop.f32.mrb[20].mxu0 }
 0x2cf   :  { %v654_v57 = vadd.f32 %v1218_v56, %v1024_v40  ;;  %v648_v58 = vpop.f32.mrb[21].mxu0 }
 0x2d0   :  { %v649_v59 = vadd.f32 %v1024_v40, %v648_v58 }
 0x2d1   :  { %v712_v63 = vmax.f32 %v654_v57, 0.0 }
 0x2d2   :  { %v711_v62 = vmax.f32 %v649_v59, 0.0 }
 0x2d4   :  { %1272 = vmatprep.mubr.f32.mxu0 %v711_v62 }
 0x2d5   :  { %1273 = vmatmul.mubr.f32.gmra.mrb[36].mxu0 %v712_v63 }
 0x2d6   :  { %v1221_v0 = vpop.f32.mrb[22].mxu0 }
 0x2d7   :  { %v664_v1 = vadd.f32 %v1221_v0, %v1024_v40  ;;  %v658_v2 = vpop.f32.mrb[23].mxu0 }
 0x2d8   :  { %v659_v3 = vadd.f32 %v1024_v40, %v658_v2 }
 0x2d9   :  { %v714_v37 = vmax.f32 %v664_v1, 0.0 }
 0x2da   :  { %v713_v54 = vmax.f32 %v659_v3, 0.0 }
 0x2dc   :  { %1275 = vmatprep.mubr.f32.mxu0 %v713_v54 }
 0x2dd   :  { %1276 = vmatmul.mubr.f32.gmra.mrb[38].mxu0 %v714_v37 }
 0x2de   :  { %v1224_v4 = vpop.f32.mrb[24].mxu0 }
 0x2df   :  { %v674_v5 = vadd.f32 %v1224_v4, %v1024_v40  ;;  %v668_v6 = vpop.f32.mrb[25].mxu0 }
 0x2e0   :  { %v669_v7 = vadd.f32 %v1024_v40, %v668_v6 }
 0x2e1   :  { %v716_v9 = vmax.f32 %v674_v5, 0.0 }
 0x2e2   :  { %v715_v8 = vmax.f32 %v669_v7, 0.0 }
 0x2e4   :  { %1278 = vmatprep.mubr.f32.mxu1 %v715_v8 }
 0x2e5   :  { %1279 = vmatmul.mubr.f32.vlgmr.msra.gmra.mrb[32].mxu1 %v716_v9 }
 0x2e6   :  { %v1227_v10 = vpop.f32.mrb[26].mxu0 }
 0x2e7   :  { %v684_v11 = vadd.f32 %v1227_v10, %v1024_v40  ;;  %v678_v12 = vpop.f32.mrb[27].mxu0 }
 0x2e8   :  { %v679_v39 = vadd.f32 %v1024_v40, %v678_v12 }
 0x2e9   :  { %v718_v14 = vmax.f32 %v684_v11, 0.0 }
 0x2ea   :  { %v717_v13 = vmax.f32 %v679_v39, 0.0 }
 0x2ec   :  { %1281 = vmatprep.mubr.f32.mxu1 %v717_v13 }
 0x2ed   :  { %1282 = vmatmul.mubr.f32.gmra.mrb[34].mxu1 %v718_v14 }
 0x2ee   :  { %v1230_v15 = vpop.f32.mrb[28].mxu0 }
 0x2ef   :  { %v694_v16 = vadd.f32 %v1230_v15, %v1024_v40  ;;  %v688_v17 = vpop.f32.mrb[29].mxu0 }
 0x2f0   :  { %v689_v18 = vadd.f32 %v1024_v40, %v688_v17 }
 0x2f1   :  { %v720_v20 = vmax.f32 %v694_v16, 0.0 }
 0x2f2   :  { %v719_v19 = vmax.f32 %v689_v18, 0.0 }
 0x2f4   :  { %1284 = vmatprep.mubr.f32.mxu1 %v719_v19 }
 0x2f5   :  { %1285 = vmatmul.mubr.f32.gmra.mrb[36].mxu1 %v720_v20 }
 0x2f6   :  { %v1233_v60 = vpop.f32.mrb[30].mxu0 }
 0x2f7   :  { %v704_v21 = vadd.f32 %v1233_v60, %v1024_v40  ;;  %v698_v42 = vpop.f32.mrb[31].mxu0 }
 0x2f8   :  { %v699_v61 = vadd.f32 %v1024_v40, %v698_v42 }
 0x2f9   :  { %v722_v23 = vmax.f32 %v704_v21, 0.0 }
 0x2fa   :  { %v721_v22 = vmax.f32 %v699_v61, 0.0 }
 0x2fc   :  { %1287 = vmatprep.mubr.f32.mxu1 %v721_v22 }
 0x2fd   :  { %1288 = vmatmul.mubr.f32.gmra.mrb[38].mxu1 %v722_v23 }
 0x398   :  { %v1268_v25 = vpop.f32.mrb[32].mxu0 }
 0x399   :  { %v818_v26 = vadd.f32 %v1268_v25, %v2186_v24  ;;  %v812_v27 = vpop.f32.mrb[33].mxu0 }
 0x39a   :  { %v813_v28 = vadd.f32 %v2186_v24, %v812_v27 }
 0x39b   :  { %v892_v29 = vmul.f32 0.5, %v818_v26 }
 0x39c   :  { %v891_v30 = vmul.f32 0.5, %v813_v28 }
 0x39d   :  { %1470 = vtanh.f32 %v892_v29 }
 0x39e   :  { %1472 = vtanh.f32 %v891_v30 }
 0x3a0   :  { %v1271_v45 = vpop.f32.mrb[34].mxu0 }
 0x3a1   :  { %v828_v31 = vadd.f32 %v1271_v45, %v2186_v24  ;;  %v822_v32 = vpop.f32.mrb[35].mxu0 }
 0x3a2   :  { %v823_v33 = vadd.f32 %v2186_v24, %v822_v32 }
 0x3a3   :  { %v894_v34 = vmul.f32 0.5, %v828_v31 }
 0x3a4   :  { %v893_v35 = vmul.f32 0.5, %v823_v33 }
 0x3a5   :  { %1474 = vtanh.f32 %v894_v34 }
 0x3a6   :  { %1476 = vtanh.f32 %v893_v35 }
 0x3a7   :  { %v1471_v36 = vpop.eup %1470 }
 0x3a8   :  { %v1473_v38 = vpop.eup %1472  ;;  %v924_v40 = vmul.f32 0.5, %v1471_v36  ;;  %v1274_v41 = vpop.f32.mrb[36].mxu0 }
 0x3a9   :  { %v923_v48 = vmul.f32 0.5, %v1473_v38  ;;  %v838_v43 = vadd.f32 %v1274_v41, %v2186_v24  ;;  %v832_v44 = vpop.f32.mrb[37].mxu0 }
 0x3aa   :  { %v940_v46 = vadd.f32 0.5, %v924_v40  ;;  %v833_v47 = vadd.f32 %v2186_v24, %v832_v44 }
 0x3ab   :  { %v939_v49 = vadd.f32 0.5, %v923_v48  ;;  %v896_v50 = vmul.f32 0.5, %v838_v43 }
 0x3ac   :  { %956 = vst [vmem:[#allocation2 + $0x8] sm:$0xff] %v940_v46  ;;  %v895_v52 = vmul.f32 0.5, %v833_v47 }
 0x3ad   :  { %955 = vst [vmem:[#allocation2] sm:$0xff] %v939_v49  ;;  %1478 = vtanh.f32 %v896_v50 }
 0x3ae   :  { %1480 = vtanh.f32 %v895_v52 }
 0x3af   :  { %v1475_v53 = vpop.eup %1474 }
 0x3b0   :  { %v1477_v55 = vpop.eup %1476  ;;  %v926_v51 = vmul.f32 0.5, %v1475_v53  ;;  %v1277_v56 = vpop.f32.mrb[38].mxu0 }
 0x3b1   :  { %v925_v57 = vmul.f32 0.5, %v1477_v55  ;;  %v848_v58 = vadd.f32 %v1277_v56, %v2186_v24  ;;  %v842_v59 = vpop.f32.mrb[39].mxu0 }
 0x3b2   :  { %v942_v62 = vadd.f32 0.5, %v926_v51  ;;  %v843_v63 = vadd.f32 %v2186_v24, %v842_v59 }
 0x3b3   :  { %v941_v0 = vadd.f32 0.5, %v925_v57  ;;  %v898_v1 = vmul.f32 0.5, %v848_v58 }
 0x3b4   :  { %958 = vst [vmem:[#allocation2 + $0x18] sm:$0xff] %v942_v62  ;;  %v897_v2 = vmul.f32 0.5, %v843_v63 }
 0x3b5   :  { %957 = vst [vmem:[#allocation2 + $0x10] sm:$0xff] %v941_v0  ;;  %1482 = vtanh.f32 %v898_v1 }
 0x3b6   :  { %1484 = vtanh.f32 %v897_v2 }
 0x3b7   :  { %v1479_v3 = vpop.eup %1478 }
 0x3b8   :  { %v1481_v54 = vpop.eup %1480  ;;  %v928_v37 = vmul.f32 0.5, %v1479_v3  ;;  %v1280_v4 = vpop.f32.mrb[32].mxu1 }
 0x3b9   :  { %v927_v5 = vmul.f32 0.5, %v1481_v54  ;;  %v858_v6 = vadd.f32 %v1280_v4, %v2186_v24  ;;  %v852_v7 = vpop.f32.mrb[33].mxu1 }
 0x3ba   :  { %v944_v8 = vadd.f32 0.5, %v928_v37  ;;  %v853_v9 = vadd.f32 %v2186_v24, %v852_v7 }
 0x3bb   :  { %v943_v10 = vadd.f32 0.5, %v927_v5  ;;  %v900_v11 = vmul.f32 0.5, %v858_v6 }
 0x3bc   :  { %960 = vst [vmem:[#allocation2 + $0x28] sm:$0xff] %v944_v8  ;;  %v899_v12 = vmul.f32 0.5, %v853_v9 }
 0x3bd   :  { %959 = vst [vmem:[#allocation2 + $0x20] sm:$0xff] %v943_v10  ;;  %1486 = vtanh.f32 %v900_v11 }
 0x3be   :  { %1488 = vtanh.f32 %v899_v12 }
 0x3bf   :  { %v1483_v39 = vpop.eup %1482 }
 0x3c0   :  { %v1485_v13 = vpop.eup %1484  ;;  %v930_v14 = vmul.f32 0.5, %v1483_v39  ;;  %v1283_v15 = vpop.f32.mrb[34].mxu1 }
 0x3c1   :  { %v929_v16 = vmul.f32 0.5, %v1485_v13  ;;  %v868_v17 = vadd.f32 %v1283_v15, %v2186_v24  ;;  %v862_v18 = vpop.f32.mrb[35].mxu1 }
 0x3c2   :  { %v946_v19 = vadd.f32 0.5, %v930_v14  ;;  %v863_v20 = vadd.f32 %v2186_v24, %v862_v18 }
 0x3c3   :  { %v945_v60 = vadd.f32 0.5, %v929_v16  ;;  %v902_v21 = vmul.f32 0.5, %v868_v17 }
 0x3c4   :  { %962 = vst [vmem:[#allocation2 + $0x38] sm:$0xff] %v946_v19  ;;  %v901_v42 = vmul.f32 0.5, %v863_v20 }
 0x3c5   :  { %961 = vst [vmem:[#allocation2 + $0x30] sm:$0xff] %v945_v60  ;;  %1490 = vtanh.f32 %v902_v21 }
 0x3c6   :  { %1492 = vtanh.f32 %v901_v42 }
 0x3c7   :  { %v1487_v61 = vpop.eup %1486 }
 0x3c8   :  { %v1489_v22 = vpop.eup %1488  ;;  %v932_v23 = vmul.f32 0.5, %v1487_v61  ;;  %v1286_v25 = vpop.f32.mrb[36].mxu1 }
 0x3c9   :  { %v931_v26 = vmul.f32 0.5, %v1489_v22  ;;  %v878_v27 = vadd.f32 %v1286_v25, %v2186_v24  ;;  %v872_v28 = vpop.f32.mrb[37].mxu1 }
 0x3ca   :  { %v948_v29 = vadd.f32 0.5, %v932_v23  ;;  %v873_v30 = vadd.f32 %v2186_v24, %v872_v28 }
 0x3cb   :  { %v947_v45 = vadd.f32 0.5, %v931_v26  ;;  %v904_v31 = vmul.f32 0.5, %v878_v27 }
 0x3cc   :  { %964 = vst [vmem:[#allocation2 + $0x48] sm:$0xff] %v948_v29  ;;  %v903_v32 = vmul.f32 0.5, %v873_v30 }
 0x3cd   :  { %963 = vst [vmem:[#allocation2 + $0x40] sm:$0xff] %v947_v45  ;;  %1494 = vtanh.f32 %v904_v31 }
 0x3ce   :  { %1496 = vtanh.f32 %v903_v32 }
 0x3cf   :  { %v1491_v33 = vpop.eup %1490 }
 0x3d0   :  { %v1493_v34 = vpop.eup %1492  ;;  %v934_v35 = vmul.f32 0.5, %v1491_v33  ;;  %v1289_v36 = vpop.f32.mrb[38].mxu1 }
 0x3d1   :  { %v933_v38 = vmul.f32 0.5, %v1493_v34  ;;  %v888_v40 = vadd.f32 %v1289_v36, %v2186_v24  ;;  %v882_v41 = vpop.f32.mrb[39].mxu1 }
 0x3d2   :  { %v950_v48 = vadd.f32 0.5, %v934_v35  ;;  %v883_v43 = vadd.f32 %v2186_v24, %v882_v41 }
 0x3d3   :  { %v949_v44 = vadd.f32 0.5, %v933_v38  ;;  %v906_v46 = vmul.f32 0.5, %v888_v40 }
 0x3d4   :  { %966 = vst [vmem:[#allocation2 + $0x58] sm:$0xff] %v950_v48  ;;  %v905_v47 = vmul.f32 0.5, %v883_v43 }
 0x3d5   :  { %965 = vst [vmem:[#allocation2 + $0x50] sm:$0xff] %v949_v44  ;;  %1498 = vtanh.f32 %v906_v46 }
 0x3d6   :  { %1500 = vtanh.f32 %v905_v47 }
 0x3d7   :  { %v1495_v49 = vpop.eup %1494 }
 0x3d8   :  { %v1497_v50 = vpop.eup %1496  ;;  %v936_v52 = vmul.f32 0.5, %v1495_v49 }
 0x3d9   :  { %v935_v53 = vmul.f32 0.5, %v1497_v50 }
 0x3da   :  { %v952_v55 = vadd.f32 0.5, %v936_v52 }
 0x3db   :  { %v951_v51 = vadd.f32 0.5, %v935_v53 }
 0x3dc   :  { %968 = vst [vmem:[#allocation2 + $0x68] sm:$0xff] %v952_v55 }
 0x3dd   :  { %967 = vst [vmem:[#allocation2 + $0x60] sm:$0xff] %v951_v51 }
 0x3df   :  { %v1499_v56 = vpop.eup %1498 }
 0x3e0   :  { %v1501_v57 = vpop.eup %1500  ;;  %v938_v24 = vmul.f32 0.5, %v1499_v56 }
 0x3e1   :  { %v937_v58 = vmul.f32 0.5, %v1501_v57 }
 0x3e2   :  { %v954_v59 = vadd.f32 0.5, %v938_v24 }
 0x3e3   :  { %v953_v62 = vadd.f32 0.5, %v937_v58 }
 0x3e4   :  { %970 = vst [vmem:[#allocation2 + $0x78] sm:$0xff] %v954_v59 }
 0x3e5   :  { %969 = vst [vmem:[#allocation2 + $0x70] sm:$0xff] %v953_v62 }
 0x3e6   :  { %1513 = shalt.err (!%p1510_p4)
}
 0x3e7   :  { %s1514_s5 = scalar_lea.hbm %s2226_s10, 2048 }
 0x3e8   :  { %p1515_p5 = scmp.ne.s32.totalorder %s2226_s10, %s1514_s5  ;;  %p1518_p6 = scmp.lt.u32.totalorder %s1514_s5, %s2226_s10 }
 0x3ea   :  { %p1520_p7 = pnand %p1518_p6, %p1515_p5 }
 0x3ec   :  { %1523 = shalt.err (!%p1520_p7)
}
 0x3ed   :  { %s1528_s28 = smov 128   ;;  %s1529_s29 = smov 8  }
 0x3ee   :  { %1014 = dma.vmem_to_hbm [thread:$0]  %s1009_s22, 2048, %s2226_s10, [#allocation3], %s1528_s28, %s1528_s28, %s1529_s29  }
 0x3ef   :  { %1524 = dma.done.wait [#allocation3], 2048  }
 0x3f0   :  { %1525 = vsyncadd [#allocation3], 4294965248 }
 0x3f1   :  { %1022 = vsyncpa [#allocation3], 1 }

</bundles_post_ra>
